<compile_context>
chip_gen: v5e
topology: v5e:2x2
jax: 0.10.0
libtpu: 0.0.40
codegen_flags: <defaults>
</compile_context>

<pallas_src>
import functools

import jax
import jax.numpy as jnp
import numpy as np
from jax.experimental import pallas as pl
from jax.experimental.pallas import tpu as pltpu

_MiB = 1024 * 1024


def _attn_net_kernel(x_ref, w1_ref, b1_ref, w2_ref, b2_ref, a_ref, *,
                     c_is_one, mxu_dtype):
    # x_ref:  (TN, L) tile of input rows (HBM dtype; cast below if requested)
    # w1_ref: (L, D)  bf16 (default) or f32 (strict path); b1_ref: (1, D) f32
    # w2_ref: (1, D) f32 if c_is_one else (D, C) f32;      b2_ref: (1, C) f32
    # a_ref:  (TN, C) attention logits
    x = x_ref[...]
    if mxu_dtype is not None:
        # In-kernel cast: bf16 MXU operands with f32 accumulation and *no*
        # extra HBM pass (the wrapper never materializes a converted copy).
        x = x.astype(mxu_dtype)
    h = jnp.dot(x, w1_ref[...], preferred_element_type=jnp.float32)
    h = jnp.tanh(h + b1_ref[...])

    if c_is_one:
        # D -> 1: VPU multiply + lane (XLU) reduction; the only MXU work per
        # step stays the big L->D matmul above.
        a = jnp.sum(h * w2_ref[...], axis=-1, keepdims=True)
    else:
        # D -> C (small C): one MXU dot; avoids per-column concat relayouts.
        a = jnp.dot(h, w2_ref[...], preferred_element_type=jnp.float32)

    a_ref[...] = (a + b2_ref[...]).astype(a_ref.dtype)


def _round_up(v, m):
    return ((v + m - 1) // m) * m


def _physical_vmem_bytes():
    try:
        return int(pltpu.get_tpu_info().vmem_capacity_bytes)
    except Exception:
        return 64 * _MiB  # conservative: v7x per-TensorCore VMEM


def _choose_tile_n(n, l, c, x_bytes, out_bytes, weight_bytes, row_align, budget):
    # x stream budgeted 3-deep (Buffered(3)); output double-buffered.
    per_row = 3 * l * x_bytes + 2 * c * out_bytes
    avail = max(budget - weight_bytes, per_row * row_align)
    tile = max(row_align, (avail // per_row) // row_align * row_align)
    tile = min(tile, 1024)  # >=512 rows already ~85% of HBM roofline
    # Guarantee >= ~8 grid steps so the DMA pipeline has overlap and both
    # v7x TensorCores get >= 4 steps each.
    tile = min(tile, max(row_align, _round_up(pl.cdiv(n, 8), row_align)))
    return int(tile)


def attn_net_forward(x, w1, b1, w2, b2, *, tile_n=None,
                     mxu_dtype=jnp.bfloat16, vmem_budget_bytes=None):
    """Pallas implementation of Attn_Net.forward: returns (A, x).

    x: (N, L); w1: (L, D); b1: (D,); w2: (D, C); b2: (C,).
    mxu_dtype: operand dtype for the L->D MXU matmul. The cast happens inside
               the kernel (no extra HBM traffic); accumulation, bias, tanh and
               the D->C stage stay f32. None => strict-f32 matmul.
    If the caller already holds x in bf16, it is streamed as-is (half traffic).
    """
    N, L = x.shape
    D = w1.shape[1]
    C = w2.shape[1]
    out_dtype = x.dtype

    # Only the (tiny) weight matrix is cast in the wrapper; x is streamed from
    # HBM in its original dtype and cast in-kernel.
    w1_c = w1 if mxu_dtype is None else w1.astype(mxu_dtype)
    x_bytes = jnp.dtype(x.dtype).itemsize
    w1_bytes = jnp.dtype(w1_c.dtype).itemsize
    out_bytes = jnp.dtype(out_dtype).itemsize
    row_align = max(8, 32 // x_bytes)  # sublane alignment: 8 f32, 16 bf16

    c_is_one = (C == 1)
    w2_arg = (jnp.transpose(w2) if c_is_one else w2).astype(jnp.float32)
    b1_2d = b1.reshape(1, D).astype(jnp.float32)
    b2_2d = b2.reshape(1, C).astype(jnp.float32)

    # Upper bound: assume weights are double-buffered (Buffered(1) may not be
    # honored by every build).
    weight_bytes = 2 * (L * D * w1_bytes + (D + D * C + C) * 4)

    phys_vmem = _physical_vmem_bytes()
    if vmem_budget_bytes is None:
        # ~64 MiB on v5e/v6e (128 MiB physical), ~32 MiB on v7x (64 MiB).
        vmem_budget_bytes = min(64 * _MiB, phys_vmem // 2)
    vmem_budget_bytes = min(vmem_budget_bytes, phys_vmem - 8 * _MiB)

    if tile_n is None:
        tile_n = _choose_tile_n(N, L, C, x_bytes, out_bytes, weight_bytes,
                                row_align, vmem_budget_bytes)
    else:
        tile_n = _round_up(int(tile_n), row_align)

    grid = (pl.cdiv(N, tile_n),)

    # Worst-case VMEM use + headroom; >= 32 MiB (beats v5e's 16 MiB default
    # scoped limit), clamped below physical VMEM (~56 MiB cap on v7x).
    vmem_used = (3 * tile_n * L * x_bytes + 2 * tile_n * C * out_bytes
                 + weight_bytes)
    vmem_limit = int(min(max(32 * _MiB, vmem_used + 8 * _MiB),
                         phys_vmem - 8 * _MiB))

    kernel = functools.partial(_attn_net_kernel, c_is_one=c_is_one,
                               mxu_dtype=mxu_dtype)

    def _run(use_pipeline_mode):
        def spec(shape, index_map, bufs=None):
            if use_pipeline_mode and bufs is not None:
                return pl.BlockSpec(shape, index_map,
                                    pipeline_mode=pl.Buffered(bufs))
            return pl.BlockSpec(shape, index_map)

        in_specs = [
            spec((tile_n, L), lambda i: (i, 0), bufs=3),    # x stream
            spec((L, D), lambda i: (0, 0), bufs=1),         # W1 (VMEM-resident)
            spec((1, D), lambda i: (0, 0), bufs=1),         # b1
            spec(w2_arg.shape, lambda i: (0, 0), bufs=1),   # W2
            spec((1, C), lambda i: (0, 0), bufs=1),         # b2
        ]
        out_spec = pl.BlockSpec((tile_n, C), lambda i: (i, 0))

        a = pl.pallas_call(
            kernel,
            out_shape=jax.ShapeDtypeStruct((N, C), out_dtype),
            grid_spec=pltpu.PrefetchScalarGridSpec(
                num_scalar_prefetch=0,
                grid=grid,
                in_specs=in_specs,
                out_specs=out_spec,
            ),
            compiler_params=pltpu.CompilerParams(
                dimension_semantics=("parallel",),
                vmem_limit_bytes=vmem_limit,
            ),
        )(x, w1_c, b1_2d, w2_arg, b2_2d)
        return jax.block_until_ready(a)

    try:
        a = _run(True)
    except Exception:
        # pipeline_mode / pl.Buffered not supported by this jax build: fall
        # back to default double-buffered BlockSpecs (same semantics).
        a = _run(False)

    # Module returns (attention logits, untouched input).
    return a, x


def init_params(key, L, D, n_classes, dtype=jnp.float32):
    """Deterministic PyTorch-style (uniform) Linear init, weights as [in, out]."""
    k1, k2, k3, k4 = jax.random.split(key, 4)
    bound1 = 1.0 / float(np.sqrt(L))
    bound2 = 1.0 / float(np.sqrt(D))
    w1 = jax.random.uniform(k1, (L, D), dtype, -bound1, bound1)
    b1 = jax.random.uniform(k2, (D,), dtype, -bound1, bound1)
    w2 = jax.random.uniform(k3, (D, n_classes), dtype, -bound2, bound2)
    b2 = jax.random.uniform(k4, (n_classes,), dtype, -bound2, bound2)
    return w1, b1, w2, b2


if __name__ == "__main__":
    # Small shapes consistent with the module (N patches x L features, 1 class).
    # N is deliberately chosen so the auto tile gives a ragged multi-step grid.
    N, L, D, n_classes = 200, 128, 64, 1

    key = jax.random.PRNGKey(0)
    kx, kp = jax.random.split(key)
    x = jax.random.normal(kx, (N, L), dtype=jnp.float32)
    w1, b1, w2, b2 = init_params(kp, L, D, n_classes)

    ref = jnp.tanh(x @ w1 + b1) @ w2 + b2

    # Default path: bf16 MXU operands via in-kernel cast, f32 accumulation.
    a, x_out = attn_net_forward(x, w1, b1, w2, b2)
    jax.block_until_ready((a, x_out))
    assert a.shape == (N, n_classes)
    assert x_out.shape == (N, L)
    assert jnp.array_equal(x_out, x)
    assert jnp.allclose(a, ref, atol=3e-2, rtol=3e-2)

    # Strict f32 MXU path.
    a32, _ = attn_net_forward(x, w1, b1, w2, b2, mxu_dtype=None)
    jax.block_until_ready(a32)
    assert jnp.allclose(a32, ref, atol=1e-4, rtol=1e-4)

    # Multi-class head (exercises the MXU D->C second stage).
    C2 = 3
    _, _, w2b, b2b = init_params(jax.random.PRNGKey(1), L, D, C2)
    ref3 = jnp.tanh(x @ w1 + b1) @ w2b + b2b
    a3, _ = attn_net_forward(x, w1, b1, w2b, b2b)
    jax.block_until_ready(a3)
    assert a3.shape == (N, C2)
    assert jnp.allclose(a3, ref3, atol=3e-2, rtol=3e-2)

    print("KERNEL_OK")
</pallas_src>

<mosaic_0001>
module attributes {stable_mosaic.version = 11 : i64} {
  func.func @_attn_net_kernel(%arg0: i32, %arg1: memref<32x128xf32, #tpu.memory_space<vmem>>, %arg2: memref<128x64xbf16, #tpu.memory_space<vmem>>, %arg3: memref<1x64xf32, #tpu.memory_space<vmem>>, %arg4: memref<1x64xf32, #tpu.memory_space<vmem>>, %arg5: memref<1x1xf32, #tpu.memory_space<vmem>>, %arg6: memref<32x1xf32, #tpu.memory_space<vmem>>) attributes {dimension_semantics = [#tpu.dimension_semantics<parallel>], iteration_bounds = array<i64: 7>, scalar_prefetch = 0 : i64, scratch_operands = 0 : i64, tpu.core_type = #tpu.core_type<tc>, window_params = [{transform_indices = @transform_0, window_bounds = array<i64: 32, 128>}, {pipeline_mode = #tpu.pipeline_mode<synchronous>, transform_indices = @transform_1, window_bounds = array<i64: 128, 64>}, {pipeline_mode = #tpu.pipeline_mode<synchronous>, transform_indices = @transform_2, window_bounds = array<i64: 1, 64>}, {pipeline_mode = #tpu.pipeline_mode<synchronous>, transform_indices = @transform_3, window_bounds = array<i64: 1, 64>}, {pipeline_mode = #tpu.pipeline_mode<synchronous>, transform_indices = @transform_4, window_bounds = array<i64: 1, 1>}, {transform_indices = @transform_5, window_bounds = array<i64: 32, 1>}]} {
    %c0 = arith.constant 0 : index
    %c0_0 = arith.constant 0 : index
    %0 = vector.load %arg1[%c0, %c0_0] : memref<32x128xf32, #tpu.memory_space<vmem>>, vector<32x128xf32>
    %1 = arith.truncf %0 : vector<32x128xf32> to vector<32x128xbf16>
    %c0_1 = arith.constant 0 : index
    %c0_2 = arith.constant 0 : index
    %2 = vector.load %arg2[%c0_1, %c0_2] : memref<128x64xbf16, #tpu.memory_space<vmem>>, vector<128x64xbf16>
    %cst = arith.constant dense<0.000000e+00> : vector<32x64xf32>
    %3 = tpu.matmul %1, %2, %cst {dimension_numbers = #tpu.dot_dimension_numbers<[1], [0], [0], [1], [0, 0, 1, 1], [], []>} : vector<32x128xbf16>, vector<128x64xbf16>, vector<32x64xf32> -> vector<32x64xf32>
    %c0_3 = arith.constant 0 : index
    %c0_4 = arith.constant 0 : index
    %4 = vector.load %arg3[%c0_3, %c0_4] : memref<1x64xf32, #tpu.memory_space<vmem>>, vector<1x64xf32>
    %5 = vector.broadcast %4 : vector<1x64xf32> to vector<32x64xf32>
    %6 = arith.addf %3, %5 : vector<32x64xf32>
    %7 = math.tanh %6 : vector<32x64xf32>
    %c0_5 = arith.constant 0 : index
    %c0_6 = arith.constant 0 : index
    %8 = vector.load %arg4[%c0_5, %c0_6] : memref<1x64xf32, #tpu.memory_space<vmem>>, vector<1x64xf32>
    %9 = vector.broadcast %8 : vector<1x64xf32> to vector<32x64xf32>
    %10 = arith.mulf %7, %9 : vector<32x64xf32>
    %cst_7 = arith.constant dense<0.000000e+00> : vector<32xf32>
    %11 = vector.multi_reduction <add>, %10, %cst_7 [1] : vector<32x64xf32> to vector<32xf32>
    %12 = vector.shape_cast %11 : vector<32xf32> to vector<32x1xf32>
    %c0_8 = arith.constant 0 : index
    %c0_9 = arith.constant 0 : index
    %13 = vector.load %arg5[%c0_8, %c0_9] : memref<1x1xf32, #tpu.memory_space<vmem>>, vector<1x1xf32>
    %14 = vector.broadcast %13 : vector<1x1xf32> to vector<32x1xf32>
    %15 = arith.addf %12, %14 : vector<32x1xf32>
    %c0_10 = arith.constant 0 : index
    %c0_11 = arith.constant 0 : index
    %16 = vector.load %arg6[%c0_10, %c0_11] : memref<32x1xf32, #tpu.memory_space<vmem>>, vector<32x1xf32>
    tpu.vector_store %arg6[%c0_10, %c0_11], %15 {strides = array<i32>} : memref<32x1xf32, #tpu.memory_space<vmem>>, vector<32x1xf32>,
    return
  }
  func.func @transform_0(%arg0: i32) -> (i32, i32) {
    %c0_i32 = arith.constant 0 : i32
    %c0_i32_0 = arith.constant 0 : i32
    return %arg0, %c0_i32 : i32, i32
  }
  func.func @transform_1(%arg0: i32) -> (i32, i32) {
    %c0_i32 = arith.constant 0 : i32
    %c0_i32_0 = arith.constant 0 : i32
    %c0_i32_1 = arith.constant 0 : i32
    return %c0_i32, %c0_i32_0 : i32, i32
  }
  func.func @transform_2(%arg0: i32) -> (i32, i32) {
    %c0_i32 = arith.constant 0 : i32
    %c0_i32_0 = arith.constant 0 : i32
    %c0_i32_1 = arith.constant 0 : i32
    return %c0_i32, %c0_i32_0 : i32, i32
  }
  func.func @transform_3(%arg0: i32) -> (i32, i32) {
    %c0_i32 = arith.constant 0 : i32
    %c0_i32_0 = arith.constant 0 : i32
    %c0_i32_1 = arith.constant 0 : i32
    return %c0_i32, %c0_i32_0 : i32, i32
  }
  func.func @transform_4(%arg0: i32) -> (i32, i32) {
    %c0_i32 = arith.constant 0 : i32
    %c0_i32_0 = arith.constant 0 : i32
    %c0_i32_1 = arith.constant 0 : i32
    return %c0_i32, %c0_i32_0 : i32, i32
  }
  func.func @transform_5(%arg0: i32) -> (i32, i32) {
    %c0_i32 = arith.constant 0 : i32
    %c0_i32_0 = arith.constant 0 : i32
    return %arg0, %c0_i32 : i32, i32
  }
}

</mosaic_0001>

<bundles_post_ra>
// kernel: tpu_custom_call.1
= control target key start
LH: loop header
LB: loop body
LE: loop exit
PB: predicated region body
PF: predicated region fallthrough
CT: control target
= control target key end

     0   :  { %s1193_s0 = inlined_call_operand.hbm [shape: f32[200,128], index: 0, kind: input, shape index: {}]   ;;  %s1194_s1 = inlined_call_operand.vmem [shape: bf16[128,64], index: 1, kind: input, shape index: {}]   ;;  %s1195_s2 = inlined_call_operand.vmem [shape: f32[1,64], index: 2, kind: input, shape index: {}]   ;;  %s1196_s3 = inlined_call_operand.vmem [shape: f32[1,64], index: 3, kind: input, shape index: {}]   ;;  %s1197_s4 = inlined_call_operand.<no memory space> [shape: f32[1,1], index: 4, kind: input, shape index: {}]   ;;  %s1198_s5 = inlined_call_operand.vmem [shape: f32[200,1], index: 5, kind: output, shape index: {}]  }
   0x1   :  { %v10_v0 = vstv %s1197_s4 }
   0x2   :  { %11 = vst [vmem:[#allocation2] sm:$0x1] %v10_v0 }
   0x3   :  { %12 = vsyncpa [#allocation4], 0 }
   0x4   :  { %14 = vsyncpa [#allocation4 + $0x1], 0  ;;  %s997_s20 = smov 0   ;;  %s999_s21 = smov 0  }
   0x5   :  { %s1001_s22 = smov 0   ;;  %s1003_s23 = smov 0  }
   0x6 LB: > { %s1016_s4 = sadd.s32 4294967295, %s927_s23   ;;  %s1019_s24 = sadd.s32 1, %s927_s23   ;;  %s927_s23 = sphi %s1003_s23, %s1208_s23   ;;  %s923_s22 = sphi %s1001_s22, %s1207_s22   ;;  %s919_s21 = sphi %s999_s21, %s1206_s21   ;;  %s915_s20 = sphi %s997_s20, %s1205_s20  }
   0x7   : > { %s24_s25 = ssub.s32 %s927_s23, %s1019_s24  ;;  %s27_s26 = sadd.s32 1, %s923_s22 }
   0x8   : > { %p25_p0 = scmp.eq.s32.totalorder %s24_s25, 0  ;;  %p34_p1 = scmp.ne.s32.totalorder %s923_s22, %s919_s21 }
   0x9   : > { %p35_p2 = scmp.eq.s32.totalorder %s927_s23, 0  ;;  %p40_p3 = scmp.ne.s32.totalorder %s919_s21, %s915_s20 }
   0xa   : > { %s1029_s27 = scalar_select %p25_p0, %s923_s22, %s27_s26  }
   0xb   : > { %p36_p4 = por %p35_p2, %p34_p1  ;;  %p41_p5 = scmp.eq.s32.totalorder %s1016_s4, 0 }
   0xc   : > { %p148_p6 = scmp.eq.s32.totalorder %s1016_s4, 6  ;;  %p632_p9 = scmp.ge.s32.totalorder %s927_s23, 7 }
   0xd   : > { %p1033_p7 = por %p41_p5, %p40_p3 }
   0xe   : > { %p1037_p8 = por %p148_p6, %p34_p1  ;;  %182 = sbr.rel (%p632_p9) target bundleno = 55 (0x37), region = 32 }
  0x13   : > { %185 = sbr.rel (!%p36_p4) target bundleno = 55 (0x37), region = 36  ;;  %s186_s30 = sand.u32 (%p36_p4), 1, %s923_s22  }
  0x14   : > { %s634_s6 = sshll.u32 (%p36_p4), %s927_s23, 2  ;;  %s633_s7 = sshll.u32 (%p36_p4), %s186_s30, 5 }
  0x15   : > { %s192_s8 = ssub.s32 (%p36_p4), 25, %s634_s6  ;;  %s1047_s12 = scalar_lea.sflag (%p36_p4), [#allocation4], %s186_s30 }
  0x16   : > { %p193_p10 = scmp.lt.s32.totalorder (%p36_p4), %s192_s8, 4  ;;  %s190_s13 = scalar_lea.vmem (%p36_p4), [#allocation3], %s633_s7 }
  0x18   : > { %s1210_s8 = smov (!%p193_p10, %s192_s8), 4 }
  0x19   : > { %s635_s9 = sshll.u32 %s1210_s8, 3 }
  0x1a   : > { %s196_s10 = ssub.s32 32, %s635_s9 }
  0x1b   : > { %s197_s11 = sshll.u32 %s196_s10, 4 }
  0x1c   : > { %198 = vsyncadd %s1047_s12, %s197_s11  ;;  %p1050_p11 = scmp.ne.s32.totalorder %s635_s9, 0  ;;  %s692_s15 = sshll.u32 %s927_s23, 5 }
  0x1d   : > { %s201_s18 = scalar_lea.hbm %s1193_s0, %s692_s15  ;;  %s1058_s19 = sshll.u32 %s190_s13, 4  ;;  %s206_s19 = int_to_ptr.vmem [resolvable:$true] %s1058_s19 }
  0x1e   : > { %s203_s20 = sshll.u32 %s201_s18, 4  ;;  %s639_s25 = sshll.u32 %s1210_s8, 7  ;;  %s1061_s20 = int_to_ptr.hbm [resolvable:$true] %s203_s20 }
  0x1f   : > { %s822_s26 = sshra.s32 %s1061_s20, 4  ;;  %s824_s30 = sshrl.u32 %s639_s25, 4  ;;  %s823_s26 = int_to_ptr.hbm [resolvable:$true] %s822_s26 }
  0x20   : > { %s829_s6 = scalar_lea.hbm %s823_s26, %s824_s30  ;;  %s833_s10 = scalar_lea.hbm %s1193_s0, 200 }
  0x21   : > { %p830_p12 = scmp.ne.s32.totalorder %s823_s26, %s829_s6  ;;  %p834_p1 = scmp.lt.s32.totalorder %s823_s26, %s1193_s0 }
  0x22   : > { %p835_p2 = scmp.lt.s32.totalorder %s833_s10, %s829_s6 }
  0x23   : > { %p831_p13 = pnand %p830_p12, %p1050_p11 }
  0x24   : > { %p836_p3 = por %p835_p2, %p834_p1 }
  0x25   : > { %p832_p0 = pneg %p831_p13 }
  0x27   : > { %p837_p4 = pnand %p836_p3, %p832_p0 }
  0x29   : > { %840 = shalt.err (!%p837_p4)
}
  0x2a   : > { %s841_s15 = sshra.s32 %s206_s19, 4  ;;  %s961_s17 = smov [#allocation3]   ;;  %s842_s15 = int_to_ptr.vmem [resolvable:$true] %s841_s15 }
  0x2b   : > { %s848_s16 = scalar_lea.vmem %s842_s15, %s824_s30  ;;  %s852_s18 = scalar_lea.vmem %s961_s17, 64 }
  0x2c   : > { %p849_p5 = scmp.ne.s32.totalorder %s842_s15, %s848_s16  ;;  %p854_p10 = scmp.lt.s32.totalorder %s852_s18, %s848_s16 }
  0x2e   : > { %p850_p6 = pnand %p849_p5, %p1050_p11 }
  0x30   : > { %p851_p9 = pneg %p850_p6 }
  0x32   : > { %p856_p12 = pnand %p854_p10, %p851_p9 }
  0x34   : > { %859 = shalt.err (!%p856_p12)
}
  0x35   : > { %s962_s26 = smov 128   ;;  %s963_s6 = smov 8  }
  0x36   : > { %211 = dma.hbm_to_vmem [thread:$0]  (%p1050_p11), %s1061_s20, %s639_s25, %s206_s19, %s1047_s12, %s962_s26, %s962_s26, %s963_s6  }
  0x37 PF: > { %p640_p13 = scmp.ge.s32.totalorder %s927_s23, 1  ;;  %p213_p0 = scmp.lt.s32.totalorder %s927_s23, 8 }
  0x39   : > { %p214_p1 = pnand %p640_p13, %p213_p0 }
  0x3a   : > { %s219_s30 = sand.u32 (!%p214_p1), 1, %s919_s21  }
  0x3b   : > { %217 = sbr.rel (%p214_p1) target bundleno = 402 (0x192), region = 40  ;;  %s1090_s7 = sshll.u32 (!%p214_p1), %s219_s30, 5 }
  0x3c   : > { %s220_s9 = scalar_lea.sflag (!%p214_p1), [#allocation4], %s219_s30  ;;  %s223_s10 = scalar_lea.vmem (!%p214_p1), [#allocation3], %s1090_s7 }
  0x40   : > { %910 = dma.done.wait (%p1033_p7), %s220_s9, 512  }
  0x41   : > { %912 = vsyncadd (%p1033_p7), %s220_s9, 4294966784  ;;  %v700_v1 = vld [vmem:[%s1194_s1 + $0x38] sm:$0xff]  ;;  %v699_v2 = vld [vmem:[%s1194_s1 + $0x30] sm:$0xff]  ;;  %vm365_vm0 = vcmask 523264   ;;  %vm386_vm1 = vcmask 7168   ;;  %s676_s23 = sshll.u32 (%p1037_p8), %s1016_s4, 2 }
  0x42   : > { %334 = vmatpush.bf16.msra.mxu0 %v700_v1  ;;  %704 = vmatpush.bf16.msra.mxu1 %v700_v1  ;;  %v698_v3 = vld [vmem:[%s1194_s1 + $0x28] sm:$0xff]  ;;  %v697_v4 = vld [vmem:[%s1194_s1 + $0x20] sm:$0xff]  ;;  %v696_v5 = vld [vmem:[%s1194_s1 + $0x18] sm:$0xff]  ;;  %s399_s14 = ssub.s32 (%p1037_p8), 25, %s676_s23 }
  0x43   : > { %v695_v6 = vld [vmem:[%s1194_s1 + $0x10] sm:$0xff]  ;;  %v694_v7 = vld [vmem:[%s1194_s1 + $0x8] sm:$0xff]  ;;  %v693_v8 = vld [vmem:[%s1194_s1] sm:$0xff]  ;;  %p400_p7 = scmp.lt.s32.totalorder (%p1037_p8), %s399_s14, 4 }
  0x44   : > { %v260_v9 = vld [vmem:[%s223_s10] sm:$0xff]  ;;  %v261_v10 = vld [vmem:[%s223_s10 + $0x8] sm:$0xff]  ;;  %v262_v11 = vld [vmem:[%s223_s10 + $0x10] sm:$0xff] }
  0x45   : > { %v263_v12 = vld [vmem:[%s223_s10 + $0x18] sm:$0xff]  ;;  %v264_v13 = vpack.c.bf16 %v261_v10, %v260_v9  ;;  %s1128_s10 = scalar_lea.vmem [#allocation5], %s1090_s7   ;;  %s701_s7 = sshll.u32 (%p1037_p8), %s1016_s4, 5 }
  0x46   : > { %335 = vmatpush.bf16.msra.mxu0 %v699_v2  ;;  %705 = vmatpush.bf16.msra.mxu1 %v699_v2  ;;  %v265_v14 = vpack.c.bf16 %v263_v12, %v262_v11  ;;  %v811_v15 = vld [vmem:[%s1195_s2] ss:$0 sm:$0xff]  ;;  %s1141_s28 = scalar_lea.vmem (%p1037_p8), %s1198_s5, %s701_s7  }
  0x47   : > { %v812_v20 = vld [vmem:[%s1196_s3] ss:$0 sm:$0xff] }
  0x48   : > { %v813_v37 = vld [vmem:[#allocation2] ss:$0 sm:$0xff] }
  0x4a   : > { %336 = vmatpush.bf16.msra.mxu0 %v698_v3  ;;  %706 = vmatpush.bf16.msra.mxu1 %v698_v3 }
  0x4e   : > { %337 = vmatpush.bf16.msra.mxu0 %v697_v4  ;;  %707 = vmatpush.bf16.msra.mxu1 %v697_v4 }
  0x52   : > { %338 = vmatpush.bf16.msra.mxu0 %v696_v5  ;;  %708 = vmatpush.bf16.msra.mxu1 %v696_v5 }
  0x56   : > { %339 = vmatpush.bf16.msra.mxu0 %v695_v6  ;;  %709 = vmatpush.bf16.msra.mxu1 %v695_v6 }
  0x5a   : > { %340 = vmatpush.bf16.msra.mxu0 %v694_v7  ;;  %710 = vmatpush.bf16.msra.mxu1 %v694_v7 }
  0x5e   : > { %341 = vmatpush.bf16.msra.mxu0 %v693_v8  ;;  %711 = vmatpush.bf16.msra.mxu1 %v693_v8 }
  0x61   : > { %342 = vmatmul.bf16.vlgmr.msra.gmra.mxu0 %v264_v13  ;;  %347 = vmatmul.bf16.vlgmr.msra.gmra.mxu1 %v265_v14 }
  0xde   : > { %v343_v16 = vpop.f32.mrf.mxu0  ;;  %v348_v17 = vpop.f32.mrf.mxu1 }
  0xdf   : > { %v344_v18 = vadd.f32 %v811_v15, %v343_v16  ;;  %v349_v19 = vadd.f32 %v811_v15, %v348_v17 }
  0xe1   : > { %814 = vtanh.f32 %v344_v18 }
  0xe2   : > { %816 = vtanh.f32 %v349_v19 }
  0xe6   : > { %v345_v21 = vpop.f32.mrf.mxu0  ;;  %v350_v22 = vpop.f32.mrf.mxu1 }
  0xe7   : > { %v815_v23 = vpop.eup %814  ;;  %v346_v24 = vadd.f32 %v811_v15, %v345_v21  ;;  %v351_v25 = vadd.f32 %v811_v15, %v350_v22 }
  0xe8   : > { %v817_v26 = vpop.eup %816  ;;  %v361_v27 = vmul.f32 %v815_v23, %v812_v20 }
  0xe9   : > { %818 = vtanh.f32 %v346_v24  ;;  %v363_v28 = vmul.f32 %v817_v26, %v812_v20 }
  0xea   : > { %820 = vtanh.f32 %v351_v25  ;;  %v366_v29 = vsel %vm365_vm0, %v361_v27, 0.0 }
  0xeb   : > { %v372_v30 = vsel %vm365_vm0, %v363_v28, 0.0  ;;  %367 = vadd.xlane.f32.xlu0 %v366_v29 }
  0xec   : > { %373 = vadd.xlane.f32.xlu1 %v372_v30 }
  0xef   : > { %v819_v31 = vpop.eup %818 }
  0xf0   : > { %v821_v32 = vpop.eup %820  ;;  %v362_v33 = vmul.f32 %v819_v31, %v812_v20 }
  0xf1   : > { %v364_v34 = vmul.f32 %v821_v32, %v812_v20 }
  0xf2   : > { %v369_v35 = vsel %vm365_vm0, %v362_v33, 0.0 }
  0xf3   : > { %v375_v36 = vsel %vm365_vm0, %v364_v34, 0.0  ;;  %370 = vadd.xlane.f32.xlu0 %v369_v35 }
  0xf4   : > { %376 = vadd.xlane.f32.xlu1 %v375_v36 }
 0x15e   : > { %v368_v38 = vpop.xlane.xlu0 %367 }
 0x15f   : > { %v374_v39 = vpop.xlane.xlu1 %373  ;;  %v382_v40 = vadd.f32 %v813_v37, %v368_v38 }
 0x160   : > { %v384_v41 = vadd.f32 %v813_v37, %v374_v39 }
 0x161   : > { %387 = vst.msk [vmem:[%s1128_s10] sm:$0xff] %vm386_vm1, %v382_v40 }
 0x162   : > { %389 = vst.msk [vmem:[%s1128_s10 + $0x10] sm:$0xff] %vm386_vm1, %v384_v41 }
 0x166   : > { %v371_v42 = vpop.xlane.xlu0 %370  ;;  %397 = sbr.rel (!%p1037_p8) target bundleno = 402 (0x192), region = 48 }
 0x167   : > { %v377_v43 = vpop.xlane.xlu1 %376  ;;  %v383_v44 = vadd.f32 %v813_v37, %v371_v42 }
 0x168   : > { %v385_v45 = vadd.f32 %v813_v37, %v377_v43 }
 0x169   : > { %388 = vst.msk [vmem:[%s1128_s10 + $0x8] sm:$0xff] %vm386_vm1, %v383_v44 }
 0x16a   : > { %390 = vst.msk [vmem:[%s1128_s10 + $0x18] sm:$0xff] %vm386_vm1, %v385_v45 }
 0x16b   : > { %s1212_s14 = smov (!%p400_p7, %s399_s14), 4 }
 0x16c   : > { %s677_s25 = sshll.u32 %s1212_s14, 3 }
 0x16d   : > { %p680_p11 = scmp.eq.s32.totalorder %s677_s25, 0 }
 0x16e   : > { %s1147_s29 = sshrl.u32 (!%p680_p11), %s1212_s14, 2 }
 0x16f   : > { %408 = sbr.rel (%p680_p11) target bundleno = 402 (0x192), region = 52  ;;  %p681_p8 = scmp.le.s32.totalorder (!%p680_p11), %s1147_s29, 0 }
 0x174   : > { %583 = sbr.rel (%p681_p8) target bundleno = 385 (0x181), region = 134  ;;  %s1202_s4 = smov (!%p681_p8), %s1141_s28 }
 0x175   : > { %s1203_s11 = smov (!%p681_p8), %s1128_s10  ;;  %s1156_s13 = smov (!%p681_p8), 0  }
 0x176   : > { %s941_s15 = smov (!%p681_p8), 0  }
 0x179 LB: >> { %v477_v46 = vld [vmem:[%s935_s11] sm:$0xff]  ;;  %v479_v47 = vld [vmem:[%s935_s11 + $0x8] sm:$0xff]  ;;  %v481_v48 = vld [vmem:[%s935_s11 + $0x10] sm:$0xff]  ;;  %s485_s16 = sadd.s32 1, %s939_s13  ;;  %s471_s15 = sadd.s32 1, %s943_s15   ;;  %s943_s15 = sphi %s941_s15, %s471_s15   ;;  %s939_s13 = sphi %s1156_s13, %s1204_s13   ;;  %s935_s11 = sphi %s1203_s11, %s490_s11   ;;  %s931_s4 = sphi %s1202_s4, %s491_s4  }
 0x17a   : >> { %478 = vst [vmem:[%s931_s4] sm:$0xff] %v477_v46  ;;  %v483_v49 = vld [vmem:[%s935_s11 + $0x18] sm:$0xff]  ;;  %p486_p2 = scmp.ge.s32.totalorder %s485_s16, %s1147_s29  ;;  %p470_p3 = scmp.ge.s32.totalorder %s471_s15, %s1147_s29 }
 0x17b   : >> { %480 = vst [vmem:[%s931_s4 + $0x8] sm:$0xff] %v479_v47 }
 0x17c   : >> { %482 = vst [vmem:[%s931_s4 + $0x10] sm:$0xff] %v481_v48  ;;  %s1214_s16 = smov (%p486_p2, %s485_s16), 0  ;;  %473 = sbr.rel (!%p470_p3) target bundleno = 377 (0x179), region = 140 }
 0x17d   : >> { %484 = vst [vmem:[%s931_s4 + $0x18] sm:$0xff] %v483_v49  ;;  %s682_s17 = sshll.u32 %s1214_s16, 5  ;;  %s1204_s13 = smov %s1214_s16 }
 0x17e   : >> { %s490_s11 = scalar_lea.vmem %s1128_s10, %s682_s17 [#allocation5]   ;;  %s491_s4 = scalar_lea.vmem %s1141_s28, %s682_s17  }
 0x181 PF: > { %s1172_s18 = sand.u32 3, %s1212_s14   ;;  %s702_s26 = sshll.u32 %s1147_s29, 5 }
 0x182   : > { %s496_s6 = scalar_lea.vmem %s1128_s10, %s702_s26 [#allocation5]   ;;  %s498_s30 = scalar_lea.vmem %s1141_s28, %s702_s26  }
 0x183   : > { %p687_p4 = scmp.le.s32.totalorder %s1172_s18, 0 }
 0x184   : > { %s945_s9 = smov (!%p687_p4), %s498_s30   ;;  %s949_s8 = smov (!%p687_p4), %s496_s6  }
 0x185   : > { %597 = sbr.rel (%p687_p4) target bundleno = 402 (0x192), region = 145  ;;  %s953_s12 = smov (!%p687_p4), 0  }
 0x186   : > { %s957_s23 = smov (!%p687_p4), 0  }
 0x18a LB: >> { %v508_v50 = vld [vmem:[%s951_s8] sm:$0xff]  ;;  %s510_s7 = sadd.s32 1, %s955_s12  ;;  %s502_s23 = sadd.s32 1, %s959_s23   ;;  %s959_s23 = sphi %s957_s23, %s502_s23   ;;  %s955_s12 = sphi %s953_s12, %s954_s12   ;;  %s951_s8 = sphi %s949_s8, %s515_s8   ;;  %s947_s9 = sphi %s945_s9, %s516_s9  }
 0x18b   : >> { %509 = vst [vmem:[%s947_s9] sm:$0xff] %v508_v50  ;;  %p511_p5 = scmp.ge.s32.totalorder %s510_s7, %s1172_s18  ;;  %p501_p6 = scmp.ge.s32.totalorder %s502_s23, %s1172_s18 }
 0x18d   : >> { %s1216_s7 = smov (%p511_p5, %s510_s7), 0  ;;  %504 = sbr.rel (!%p501_p6) target bundleno = 394 (0x18a), region = 151 }
 0x18e   : >> { %s688_s10 = sshll.u32 %s1216_s7, 3  ;;  %s954_s12 = smov %s1216_s7  }
 0x18f   : >> { %s515_s8 = scalar_lea.vmem %s496_s6, %s688_s10 [#allocation5]   ;;  %s516_s9 = scalar_lea.vmem %s498_s30, %s688_s10  }
 0x192 PF: > { %p17_p9 = scmp.ge.s32.totalorder %s1019_s24, 9   ;;  %s1205_s20 = smov %s919_s21 }
 0x193   : > { %s1206_s21 = smov %s923_s22  ;;  %s1207_s22 = smov %s1029_s27 }
 0x194   : > { %s1208_s23 = smov %s1019_s24  ;;  %19 = sbr.rel (!%p17_p9) target bundleno = 6 (0x6), region = 162 }
 0x199   :  { %532 = vsyncpa [#allocation4], 1 }
 0x19a   :  { %534 = vsyncpa [#allocation4 + $0x1], 1 }

</bundles_post_ra>
